<compile_context>
chip_gen: v5e
topology: v5e:2x2
jax: 0.10.0
libtpu: 0.0.40
codegen_flags: <defaults>
</compile_context>

<pallas_src>
import jax
import jax.numpy as jnp
from jax import lax
from jax.experimental import pallas as pl
from jax.experimental.pallas import tpu as pltpu

LANES = 128  # every GEMM lane (output) dim padded to one full vreg lane width


# ----------------------------- Pallas kernel -------------------------------

def cnn_fused_kernel(patches_ref, w1_ref, b1_ref, w2_ref, b2_ref,
                     wf1_ref, bf1_ref, wf2_ref, bf2_ref, out_ref):
    """Fused CNN forward (eval mode) for one batch tile.

    patches_ref: (4, bt, 128) bf16  conv1 im2col; dim0 = 2x2 pool offset,
                                    lane = p*9 + k (p = pooled 3x3 pos,
                                    k = 3x3 patch feature), lanes 81.. are 0
    w1_ref : (128, 128) bf16        block-diag kron(I9, w1): rows p*9+k,
                                    cols p*10+c (90 real cols)
    b1_ref : (1, 128) f32           conv1 bias tiled 9x (lane = p*10+c)
    w2_ref : (128, 128) bf16        conv2 as one GEMM: rows p*10+c, cols oc
    b2_ref : (1, 128) f32
    wf1_ref: (128, 128) bf16        fc1 weight.T, [:20, :50] real
    bf1_ref: (1, 128) f32
    wf2_ref: (128, 128) bf16        fc2 weight.T, [:50, :10] real
    bf2_ref: (1, 128) f32           fc2 bias; lanes 10.. hold -1e30 (mask)
    out_ref: (bt, 128) f32          log_softmax values live in lanes [:10]
    """
    # conv1 + max_pool2d(2): one GEMM per pool offset, max-accumulated in
    # registers (no scratch); bias added after the pool, then relu.
    c = jnp.dot(patches_ref[0], w1_ref[...], preferred_element_type=jnp.float32)
    for off in range(1, 4):
        c = jnp.maximum(
            c, jnp.dot(patches_ref[off], w1_ref[...],
                       preferred_element_type=jnp.float32))
    h1 = jnp.maximum(c + b1_ref[...], 0.0)          # (bt, 128), lane = p*10+c

    # conv2 (3x3 over the 3x3 pooled map -> 1x1) as ONE K=90 GEMM; Dropout2d
    # and max_pool2d(1) are identity in eval mode; relu follows.
    h2 = jnp.dot(h1.astype(jnp.bfloat16), w2_ref[...],
                 preferred_element_type=jnp.float32) + b2_ref[...]
    h2 = jnp.maximum(h2, 0.0)

    # fc1 -> relu   (F.dropout is identity in eval mode)
    h3 = jnp.dot(h2.astype(jnp.bfloat16), wf1_ref[...],
                 preferred_element_type=jnp.float32) + bf1_ref[...]
    h3 = jnp.maximum(h3, 0.0)

    # fc2 (padding-lane mask is baked into bf2) -> log_softmax.
    z = jnp.dot(h3.astype(jnp.bfloat16), wf2_ref[...],
                preferred_element_type=jnp.float32) + bf2_ref[...]
    m = jnp.max(z, axis=-1, keepdims=True)
    lse = jnp.log(jnp.sum(jnp.exp(z - m), axis=-1, keepdims=True)) + m
    out_ref[...] = z - lse


# ------------------------------- JAX glue ----------------------------------

def prepare_params(params):
    """One-time weight packing (hoisted out of the forward)."""
    f32, bf16 = jnp.float32, jnp.bfloat16
    # conv1: (10,1,3,3) -> (9,10) [k=fh*3+fw, c]; block-diagonal so the GEMM
    # output lane is p*10+c (p = pooled position) -> pad to (128,128).
    w1m = params["w1"].reshape(10, 9).T.astype(f32)                  # (9, 10)
    w1_blk = jnp.kron(jnp.eye(9, dtype=f32), w1m)                    # (81, 90)
    w1p = jnp.zeros((LANES, LANES), f32).at[:81, :90].set(w1_blk).astype(bf16)
    b1p = jnp.zeros((1, LANES), f32).at[0, :90].set(
        jnp.tile(params["b1"].astype(f32), 9))
    # conv2 as one K=90 GEMM: row = p*10 + in_c, col = out_c.
    w2m = jnp.transpose(params["w2"], (2, 3, 1, 0)).reshape(90, 20).astype(f32)
    w2p = jnp.zeros((LANES, LANES), f32).at[:90, :20].set(w2m).astype(bf16)
    b2p = jnp.zeros((1, LANES), f32).at[0, :20].set(params["b2"].astype(f32))
    # fc layers: y = x @ W.T + b.  fc2 bias carries the -1e30 log_softmax mask.
    wf1p = jnp.zeros((LANES, LANES), f32).at[:20, :50].set(
        params["fc1_w"].T.astype(f32)).astype(bf16)
    bf1p = jnp.zeros((1, LANES), f32).at[0, :50].set(params["fc1_b"].astype(f32))
    wf2p = jnp.zeros((LANES, LANES), f32).at[:50, :10].set(
        params["fc2_w"].T.astype(f32)).astype(bf16)
    bf2p = jnp.full((1, LANES), -1e30, f32).at[0, :10].set(
        params["fc2_b"].astype(f32))
    return (w1p, b1p, w2p, b2p, wf1p, bf1p, wf2p, bf2p)


def _build_patches(x):
    """(B,1,8,8) f32 -> (4, B, 128) bf16 im2col, lane = p*9 + k (81 real)."""
    B = x.shape[0]
    p = lax.conv_general_dilated_patches(
        x, filter_shape=(3, 3), window_strides=(1, 1), padding='VALID',
        dimension_numbers=('NCHW', 'OIHW', 'NCHW'))          # (B, 9, 6, 6)
    p = p.reshape(B, 9, 3, 2, 3, 2)                          # (b, k, i, dh, j, dw)
    p = jnp.transpose(p, (3, 5, 0, 2, 4, 1))                 # (dh, dw, b, i, j, k)
    p = p.reshape(4, B, 81)                                  # off = dh*2+dw
    p = jnp.pad(p, ((0, 0), (0, 0), (0, LANES - 81)))
    return p.astype(jnp.bfloat16)


def _pick_batch_tile(B):
    for bt in (512, 256, 128, 64, 32, 16):
        if B % bt == 0:
            return bt
    return B          # small / ragged batch: single whole-array block


def _cost_estimate(B):
    flops = 2 * B * LANES * LANES * 7            # 4 conv1 GEMMs + conv2 + fc1 + fc2
    transcendentals = B * (LANES + 1)            # exp row + log
    bytes_accessed = (4 * B * LANES * 2          # patches (bf16)
                      + 4 * LANES * LANES * 2    # 4 weight matrices (bf16)
                      + 4 * LANES * 4            # 4 bias rows (f32)
                      + B * LANES * 4)           # output (f32)
    return pl.CostEstimate(flops=flops, transcendentals=transcendentals,
                           bytes_accessed=bytes_accessed)


def cnn_forward(x_nchw, prepped):
    """x_nchw: (B, 1, 8, 8) float32 -> (B, 10) log-probabilities."""
    B = x_nchw.shape[0]
    patches = _build_patches(x_nchw.astype(jnp.float32))
    bt = _pick_batch_tile(B)
    grid = (B // bt,)

    weight_spec = pl.BlockSpec((LANES, LANES), lambda i: (0, 0))  # resident
    bias_spec = pl.BlockSpec((1, LANES), lambda i: (0, 0))        # resident

    out = pl.pallas_call(
        cnn_fused_kernel,
        out_shape=jax.ShapeDtypeStruct((B, LANES), jnp.float32),
        grid_spec=pltpu.PrefetchScalarGridSpec(
            num_scalar_prefetch=0,
            grid=grid,
            in_specs=[
                pl.BlockSpec((4, bt, LANES), lambda i: (0, i, 0)),  # patches
                weight_spec, bias_spec,                              # conv1
                weight_spec, bias_spec,                              # conv2
                weight_spec, bias_spec,                              # fc1
                weight_spec, bias_spec,                              # fc2
            ],
            out_specs=pl.BlockSpec((bt, LANES), lambda i: (i, 0)),
        ),
        compiler_params=pltpu.CompilerParams(
            dimension_semantics=("parallel",)),
        cost_estimate=_cost_estimate(B),
    )(patches, *prepped)
    return out[:, :10]


def reference_forward(x, params):
    """Pure-JAX reference matching the PyTorch module in eval mode."""
    B = x.shape[0]
    y = lax.conv_general_dilated(x, params["w1"], (1, 1), 'VALID',
                                 dimension_numbers=('NCHW', 'OIHW', 'NCHW'))
    y = y + params["b1"].reshape(1, 10, 1, 1)
    y = y.reshape(B, 10, 3, 2, 3, 2).max(axis=(3, 5))     # max_pool2d(2)
    y = jnp.maximum(y, 0.0)
    y = lax.conv_general_dilated(y, params["w2"], (1, 1), 'VALID',
                                 dimension_numbers=('NCHW', 'OIHW', 'NCHW'))
    y = y + params["b2"].reshape(1, 20, 1, 1)
    y = jnp.maximum(y, 0.0).reshape(B, 20)
    y = jnp.maximum(y @ params["fc1_w"].T + params["fc1_b"], 0.0)
    y = y @ params["fc2_w"].T + params["fc2_b"]
    return jax.nn.log_softmax(y, axis=1)


def init_params(key):
    ks = jax.random.split(key, 8)

    def u(k, shape, fan_in):
        bound = 1.0 / (fan_in ** 0.5)
        return jax.random.uniform(k, shape, jnp.float32, -bound, bound)

    return {
        "w1": u(ks[0], (10, 1, 3, 3), 1 * 3 * 3),
        "b1": u(ks[1], (10,), 1 * 3 * 3),
        "w2": u(ks[2], (20, 10, 3, 3), 10 * 3 * 3),
        "b2": u(ks[3], (20,), 10 * 3 * 3),
        "fc1_w": u(ks[4], (50, 20), 20),
        "fc1_b": u(ks[5], (50,), 20),
        "fc2_w": u(ks[6], (10, 50), 50),
        "fc2_b": u(ks[7], (10,), 50),
    }


if __name__ == "__main__":
    key = jax.random.PRNGKey(0)
    k_x, k_p = jax.random.split(key)
    params = init_params(k_p)
    prepped = prepare_params(params)          # one-time weight packing (hoisted)

    fwd = jax.jit(cnn_forward)

    # Small batch (not a multiple of 8) -> single whole-array block path.
    x = jax.random.normal(k_x, (2, 1, 8, 8), dtype=jnp.float32)
    logp = fwd(x, prepped)
    jax.block_until_ready(logp)
    assert logp.shape == (2, 10)
    assert bool(jnp.all(jnp.isfinite(logp)))
    # log_softmax rows must sum (in prob space) to ~1
    assert bool(jnp.all(jnp.abs(jnp.sum(jnp.exp(logp), axis=1) - 1.0) < 1e-4))
    ref = reference_forward(x, params)
    assert bool(jnp.allclose(logp, ref, atol=5e-2, rtol=5e-2))

    # Larger batch exercising the parallel batch grid (3 tiles of 16).
    x2 = jax.random.normal(k_x, (48, 1, 8, 8), dtype=jnp.float32)
    logp2 = fwd(x2, prepped)
    jax.block_until_ready(logp2)
    ref2 = reference_forward(x2, params)
    assert logp2.shape == (48, 10)
    assert bool(jnp.allclose(logp2, ref2, atol=5e-2, rtol=5e-2))

    print("KERNEL_OK")
</pallas_src>

<mosaic_0001>
module attributes {stable_mosaic.version = 11 : i64} {
  func.func @cnn_fused_kernel(%arg0: i32, %arg1: memref<4x2x128xbf16, #tpu.memory_space<vmem>>, %arg2: memref<128x128xbf16, #tpu.memory_space<vmem>>, %arg3: memref<1x128xf32, #tpu.memory_space<vmem>>, %arg4: memref<128x128xbf16, #tpu.memory_space<vmem>>, %arg5: memref<1x128xf32, #tpu.memory_space<vmem>>, %arg6: memref<128x128xbf16, #tpu.memory_space<vmem>>, %arg7: memref<1x128xf32, #tpu.memory_space<vmem>>, %arg8: memref<128x128xbf16, #tpu.memory_space<vmem>>, %arg9: memref<1x128xf32, #tpu.memory_space<vmem>>, %arg10: memref<2x128xf32, #tpu.memory_space<vmem>>) attributes {dimension_semantics = [#tpu.dimension_semantics<parallel>], iteration_bounds = array<i64: 1>, scalar_prefetch = 0 : i64, scratch_operands = 0 : i64, tpu.core_type = #tpu.core_type<tc>, window_params = [{transform_indices = @transform_0, window_bounds = array<i64: 4, 2, 128>}, {pipeline_mode = #tpu.pipeline_mode<synchronous>, transform_indices = @transform_1, window_bounds = array<i64: 128, 128>}, {pipeline_mode = #tpu.pipeline_mode<synchronous>, transform_indices = @transform_2, window_bounds = array<i64: 1, 128>}, {pipeline_mode = #tpu.pipeline_mode<synchronous>, transform_indices = @transform_3, window_bounds = array<i64: 128, 128>}, {pipeline_mode = #tpu.pipeline_mode<synchronous>, transform_indices = @transform_4, window_bounds = array<i64: 1, 128>}, {pipeline_mode = #tpu.pipeline_mode<synchronous>, transform_indices = @transform_5, window_bounds = array<i64: 128, 128>}, {pipeline_mode = #tpu.pipeline_mode<synchronous>, transform_indices = @transform_6, window_bounds = array<i64: 1, 128>}, {pipeline_mode = #tpu.pipeline_mode<synchronous>, transform_indices = @transform_7, window_bounds = array<i64: 128, 128>}, {pipeline_mode = #tpu.pipeline_mode<synchronous>, transform_indices = @transform_8, window_bounds = array<i64: 1, 128>}, {transform_indices = @transform_9, window_bounds = array<i64: 2, 128>}]} {
    %c0 = arith.constant 0 : index
    %c0_0 = arith.constant 0 : index
    %c0_1 = arith.constant 0 : index
    %0 = vector.load %arg1[%c0, %c0_0, %c0_1] : memref<4x2x128xbf16, #tpu.memory_space<vmem>>, vector<1x2x128xbf16>
    %1 = vector.shape_cast %0 : vector<1x2x128xbf16> to vector<2x128xbf16>
    %c0_2 = arith.constant 0 : index
    %c0_3 = arith.constant 0 : index
    %2 = vector.load %arg2[%c0_2, %c0_3] : memref<128x128xbf16, #tpu.memory_space<vmem>>, vector<128x128xbf16>
    %cst = arith.constant dense<0.000000e+00> : vector<2x128xf32>
    %3 = tpu.matmul %1, %2, %cst {dimension_numbers = #tpu.dot_dimension_numbers<[1], [0], [0], [1], [0, 0, 1, 1], [], []>} : vector<2x128xbf16>, vector<128x128xbf16>, vector<2x128xf32> -> vector<2x128xf32>
    %c1 = arith.constant 1 : index
    %c0_4 = arith.constant 0 : index
    %c0_5 = arith.constant 0 : index
    %4 = vector.load %arg1[%c1, %c0_4, %c0_5] : memref<4x2x128xbf16, #tpu.memory_space<vmem>>, vector<1x2x128xbf16>
    %5 = vector.shape_cast %4 : vector<1x2x128xbf16> to vector<2x128xbf16>
    %c0_6 = arith.constant 0 : index
    %c0_7 = arith.constant 0 : index
    %6 = vector.load %arg2[%c0_6, %c0_7] : memref<128x128xbf16, #tpu.memory_space<vmem>>, vector<128x128xbf16>
    %cst_8 = arith.constant dense<0.000000e+00> : vector<2x128xf32>
    %7 = tpu.matmul %5, %6, %cst_8 {dimension_numbers = #tpu.dot_dimension_numbers<[1], [0], [0], [1], [0, 0, 1, 1], [], []>} : vector<2x128xbf16>, vector<128x128xbf16>, vector<2x128xf32> -> vector<2x128xf32>
    %8 = arith.maximumf %3, %7 : vector<2x128xf32>
    %c2 = arith.constant 2 : index
    %c0_9 = arith.constant 0 : index
    %c0_10 = arith.constant 0 : index
    %9 = vector.load %arg1[%c2, %c0_9, %c0_10] : memref<4x2x128xbf16, #tpu.memory_space<vmem>>, vector<1x2x128xbf16>
    %10 = vector.shape_cast %9 : vector<1x2x128xbf16> to vector<2x128xbf16>
    %c0_11 = arith.constant 0 : index
    %c0_12 = arith.constant 0 : index
    %11 = vector.load %arg2[%c0_11, %c0_12] : memref<128x128xbf16, #tpu.memory_space<vmem>>, vector<128x128xbf16>
    %cst_13 = arith.constant dense<0.000000e+00> : vector<2x128xf32>
    %12 = tpu.matmul %10, %11, %cst_13 {dimension_numbers = #tpu.dot_dimension_numbers<[1], [0], [0], [1], [0, 0, 1, 1], [], []>} : vector<2x128xbf16>, vector<128x128xbf16>, vector<2x128xf32> -> vector<2x128xf32>
    %13 = arith.maximumf %8, %12 : vector<2x128xf32>
    %c3 = arith.constant 3 : index
    %c0_14 = arith.constant 0 : index
    %c0_15 = arith.constant 0 : index
    %14 = vector.load %arg1[%c3, %c0_14, %c0_15] : memref<4x2x128xbf16, #tpu.memory_space<vmem>>, vector<1x2x128xbf16>
    %15 = vector.shape_cast %14 : vector<1x2x128xbf16> to vector<2x128xbf16>
    %c0_16 = arith.constant 0 : index
    %c0_17 = arith.constant 0 : index
    %16 = vector.load %arg2[%c0_16, %c0_17] : memref<128x128xbf16, #tpu.memory_space<vmem>>, vector<128x128xbf16>
    %cst_18 = arith.constant dense<0.000000e+00> : vector<2x128xf32>
    %17 = tpu.matmul %15, %16, %cst_18 {dimension_numbers = #tpu.dot_dimension_numbers<[1], [0], [0], [1], [0, 0, 1, 1], [], []>} : vector<2x128xbf16>, vector<128x128xbf16>, vector<2x128xf32> -> vector<2x128xf32>
    %18 = arith.maximumf %13, %17 : vector<2x128xf32>
    %c0_19 = arith.constant 0 : index
    %c0_20 = arith.constant 0 : index
    %19 = vector.load %arg3[%c0_19, %c0_20] : memref<1x128xf32, #tpu.memory_space<vmem>>, vector<1x128xf32>
    %20 = vector.broadcast %19 : vector<1x128xf32> to vector<2x128xf32>
    %21 = arith.addf %18, %20 : vector<2x128xf32>
    %cst_21 = arith.constant 0.000000e+00 : f32
    %22 = vector.broadcast %cst_21 : f32 to vector<2x128xf32>
    %23 = arith.maximumf %21, %22 : vector<2x128xf32>
    %24 = arith.truncf %23 : vector<2x128xf32> to vector<2x128xbf16>
    %c0_22 = arith.constant 0 : index
    %c0_23 = arith.constant 0 : index
    %25 = vector.load %arg4[%c0_22, %c0_23] : memref<128x128xbf16, #tpu.memory_space<vmem>>, vector<128x128xbf16>
    %cst_24 = arith.constant dense<0.000000e+00> : vector<2x128xf32>
    %26 = tpu.matmul %24, %25, %cst_24 {dimension_numbers = #tpu.dot_dimension_numbers<[1], [0], [0], [1], [0, 0, 1, 1], [], []>} : vector<2x128xbf16>, vector<128x128xbf16>, vector<2x128xf32> -> vector<2x128xf32>
    %c0_25 = arith.constant 0 : index
    %c0_26 = arith.constant 0 : index
    %27 = vector.load %arg5[%c0_25, %c0_26] : memref<1x128xf32, #tpu.memory_space<vmem>>, vector<1x128xf32>
    %28 = vector.broadcast %27 : vector<1x128xf32> to vector<2x128xf32>
    %29 = arith.addf %26, %28 : vector<2x128xf32>
    %cst_27 = arith.constant 0.000000e+00 : f32
    %30 = vector.broadcast %cst_27 : f32 to vector<2x128xf32>
    %31 = arith.maximumf %29, %30 : vector<2x128xf32>
    %32 = arith.truncf %31 : vector<2x128xf32> to vector<2x128xbf16>
    %c0_28 = arith.constant 0 : index
    %c0_29 = arith.constant 0 : index
    %33 = vector.load %arg6[%c0_28, %c0_29] : memref<128x128xbf16, #tpu.memory_space<vmem>>, vector<128x128xbf16>
    %cst_30 = arith.constant dense<0.000000e+00> : vector<2x128xf32>
    %34 = tpu.matmul %32, %33, %cst_30 {dimension_numbers = #tpu.dot_dimension_numbers<[1], [0], [0], [1], [0, 0, 1, 1], [], []>} : vector<2x128xbf16>, vector<128x128xbf16>, vector<2x128xf32> -> vector<2x128xf32>
    %c0_31 = arith.constant 0 : index
    %c0_32 = arith.constant 0 : index
    %35 = vector.load %arg7[%c0_31, %c0_32] : memref<1x128xf32, #tpu.memory_space<vmem>>, vector<1x128xf32>
    %36 = vector.broadcast %35 : vector<1x128xf32> to vector<2x128xf32>
    %37 = arith.addf %34, %36 : vector<2x128xf32>
    %cst_33 = arith.constant 0.000000e+00 : f32
    %38 = vector.broadcast %cst_33 : f32 to vector<2x128xf32>
    %39 = arith.maximumf %37, %38 : vector<2x128xf32>
    %40 = arith.truncf %39 : vector<2x128xf32> to vector<2x128xbf16>
    %c0_34 = arith.constant 0 : index
    %c0_35 = arith.constant 0 : index
    %41 = vector.load %arg8[%c0_34, %c0_35] : memref<128x128xbf16, #tpu.memory_space<vmem>>, vector<128x128xbf16>
    %cst_36 = arith.constant dense<0.000000e+00> : vector<2x128xf32>
    %42 = tpu.matmul %40, %41, %cst_36 {dimension_numbers = #tpu.dot_dimension_numbers<[1], [0], [0], [1], [0, 0, 1, 1], [], []>} : vector<2x128xbf16>, vector<128x128xbf16>, vector<2x128xf32> -> vector<2x128xf32>
    %c0_37 = arith.constant 0 : index
    %c0_38 = arith.constant 0 : index
    %43 = vector.load %arg9[%c0_37, %c0_38] : memref<1x128xf32, #tpu.memory_space<vmem>>, vector<1x128xf32>
    %44 = vector.broadcast %43 : vector<1x128xf32> to vector<2x128xf32>
    %45 = arith.addf %42, %44 : vector<2x128xf32>
    %cst_39 = arith.constant dense<0xFF800000> : vector<2xf32>
    %46 = vector.multi_reduction <maximumf>, %45, %cst_39 [1] : vector<2x128xf32> to vector<2xf32>
    %47 = vector.shape_cast %46 : vector<2xf32> to vector<2x1xf32>
    %48 = vector.broadcast %47 : vector<2x1xf32> to vector<2x128xf32>
    %49 = arith.subf %45, %48 : vector<2x128xf32>
    %50 = math.exp %49 : vector<2x128xf32>
    %cst_40 = arith.constant dense<0.000000e+00> : vector<2xf32>
    %51 = vector.multi_reduction <add>, %50, %cst_40 [1] : vector<2x128xf32> to vector<2xf32>
    %52 = vector.shape_cast %51 : vector<2xf32> to vector<2x1xf32>
    %53 = math.log %52 : vector<2x1xf32>
    %54 = arith.addf %53, %47 : vector<2x1xf32>
    %55 = vector.broadcast %54 : vector<2x1xf32> to vector<2x128xf32>
    %56 = arith.subf %45, %55 : vector<2x128xf32>
    %c0_41 = arith.constant 0 : index
    %c0_42 = arith.constant 0 : index
    %57 = vector.load %arg10[%c0_41, %c0_42] : memref<2x128xf32, #tpu.memory_space<vmem>>, vector<2x128xf32>
    tpu.vector_store %arg10[%c0_41, %c0_42], %56 {strides = array<i32>} : memref<2x128xf32, #tpu.memory_space<vmem>>, vector<2x128xf32>,
    return
  }
  func.func @transform_0(%arg0: i32) -> (i32, i32, i32) {
    %c0_i32 = arith.constant 0 : i32
    %c0_i32_0 = arith.constant 0 : i32
    %c0_i32_1 = arith.constant 0 : i32
    return %c0_i32, %arg0, %c0_i32_0 : i32, i32, i32
  }
  func.func @transform_1(%arg0: i32) -> (i32, i32) {
    %c0_i32 = arith.constant 0 : i32
    %c0_i32_0 = arith.constant 0 : i32
    %c0_i32_1 = arith.constant 0 : i32
    return %c0_i32, %c0_i32_0 : i32, i32
  }
  func.func @transform_2(%arg0: i32) -> (i32, i32) {
    %c0_i32 = arith.constant 0 : i32
    %c0_i32_0 = arith.constant 0 : i32
    %c0_i32_1 = arith.constant 0 : i32
    return %c0_i32, %c0_i32_0 : i32, i32
  }
  func.func @transform_3(%arg0: i32) -> (i32, i32) {
    %c0_i32 = arith.constant 0 : i32
    %c0_i32_0 = arith.constant 0 : i32
    %c0_i32_1 = arith.constant 0 : i32
    return %c0_i32, %c0_i32_0 : i32, i32
  }
  func.func @transform_4(%arg0: i32) -> (i32, i32) {
    %c0_i32 = arith.constant 0 : i32
    %c0_i32_0 = arith.constant 0 : i32
    %c0_i32_1 = arith.constant 0 : i32
    return %c0_i32, %c0_i32_0 : i32, i32
  }
  func.func @transform_5(%arg0: i32) -> (i32, i32) {
    %c0_i32 = arith.constant 0 : i32
    %c0_i32_0 = arith.constant 0 : i32
    %c0_i32_1 = arith.constant 0 : i32
    return %c0_i32, %c0_i32_0 : i32, i32
  }
  func.func @transform_6(%arg0: i32) -> (i32, i32) {
    %c0_i32 = arith.constant 0 : i32
    %c0_i32_0 = arith.constant 0 : i32
    %c0_i32_1 = arith.constant 0 : i32
    return %c0_i32, %c0_i32_0 : i32, i32
  }
  func.func @transform_7(%arg0: i32) -> (i32, i32) {
    %c0_i32 = arith.constant 0 : i32
    %c0_i32_0 = arith.constant 0 : i32
    %c0_i32_1 = arith.constant 0 : i32
    return %c0_i32, %c0_i32_0 : i32, i32
  }
  func.func @transform_8(%arg0: i32) -> (i32, i32) {
    %c0_i32 = arith.constant 0 : i32
    %c0_i32_0 = arith.constant 0 : i32
    %c0_i32_1 = arith.constant 0 : i32
    return %c0_i32, %c0_i32_0 : i32, i32
  }
  func.func @transform_9(%arg0: i32) -> (i32, i32) {
    %c0_i32 = arith.constant 0 : i32
    %c0_i32_0 = arith.constant 0 : i32
    return %arg0, %c0_i32 : i32, i32
  }
}

</mosaic_0001>

<bundles_post_ra>
// kernel: cnn_forward.1
= control target key start
LH: loop header
LB: loop body
LE: loop exit
PB: predicated region body
PF: predicated region fallthrough
CT: control target
= control target key end

     0   :  { %s816_s0 = inlined_call_operand.vmem [shape: bf16[4,2,128], index: 0, kind: input, shape index: {}]   ;;  %s817_s1 = inlined_call_operand.vmem [shape: bf16[128,128], index: 1, kind: input, shape index: {}]   ;;  %s818_s2 = inlined_call_operand.vmem [shape: f32[1,128], index: 2, kind: input, shape index: {}]   ;;  %s819_s3 = inlined_call_operand.vmem [shape: bf16[128,128], index: 3, kind: input, shape index: {}]   ;;  %s820_s4 = inlined_call_operand.vmem [shape: f32[1,128], index: 4, kind: input, shape index: {}]   ;;  %s821_s5 = inlined_call_operand.vmem [shape: bf16[128,128], index: 5, kind: input, shape index: {}]   ;;  %s822_s6 = inlined_call_operand.vmem [shape: f32[1,128], index: 6, kind: input, shape index: {}]   ;;  %s823_s7 = inlined_call_operand.vmem [shape: bf16[128,128], index: 7, kind: input, shape index: {}]   ;;  %s824_s8 = inlined_call_operand.vmem [shape: f32[1,128], index: 8, kind: input, shape index: {}]   ;;  %s825_s9 = inlined_call_operand.hbm [shape: f32[2,128], index: 9, kind: output, shape index: {}]  }
   0x1   :  { %v582_v0 = vld [vmem:[%s817_s1 + $0x38] sm:$0xff]  ;;  %v581_v1 = vld [vmem:[%s817_s1 + $0x30] sm:$0xff]  ;;  %v580_v2 = vld [vmem:[%s817_s1 + $0x28] sm:$0xff] }
   0x2   :  { %98 = vmatpush.bf16.msra.mxu0 %v582_v0  ;;  %113 = vmatpush.bf16.msra.mxu1 %v582_v0 }
   0x3   :  { %129 = vmatpush.bf16.msra.mxu2 %v582_v0  ;;  %145 = vmatpush.bf16.msra.mxu3 %v582_v0 }
   0x6   :  { %99 = vmatpush.bf16.msra.mxu0 %v581_v1  ;;  %114 = vmatpush.bf16.msra.mxu1 %v581_v1 }
   0x7   :  { %14 = vsyncpa [#allocation3], 0  ;;  %130 = vmatpush.bf16.msra.mxu2 %v581_v1  ;;  %146 = vmatpush.bf16.msra.mxu3 %v581_v1  ;;  %v579_v3 = vld [vmem:[%s817_s1 + $0x20] sm:$0xff]  ;;  %v578_v4 = vld [vmem:[%s817_s1 + $0x18] sm:$0xff]  ;;  %vm413_vm0 = vcmask 1041408   ;;  %s435_s17 = sshll.u32 %s825_s9, 4  ;;  %s436_s17 = int_to_ptr.hbm [resolvable:$true] %s435_s17 }
   0x8   :  { %v577_v5 = vld [vmem:[%s817_s1 + $0x10] sm:$0xff]  ;;  %v576_v6 = vld [vmem:[%s817_s1 + $0x8] sm:$0xff]  ;;  %v575_v7 = vld [vmem:[%s817_s1] sm:$0xff] }
   0x9   :  { %v590_v8 = vld [vmem:[%s819_s3 + $0x38] sm:$0xff]  ;;  %v33_v9 = vld [vmem:[%s816_s0] sm:$0x1]  ;;  %v476_v10 = vld [vmem:[%s816_s0 + $0x1] sm:$0x1] }
   0xa   :  { %100 = vmatpush.bf16.msra.mxu0 %v580_v2  ;;  %115 = vmatpush.bf16.msra.mxu1 %v580_v2  ;;  %v477_v11 = vld [vmem:[%s816_s0 + $0x2] sm:$0x1]  ;;  %v478_v12 = vld [vmem:[%s816_s0 + $0x3] sm:$0x1]  ;;  %v589_v13 = vld [vmem:[%s819_s3 + $0x30] sm:$0xff] }
   0xb   :  { %131 = vmatpush.bf16.msra.mxu2 %v580_v2  ;;  %147 = vmatpush.bf16.msra.mxu3 %v580_v2  ;;  %v588_v14 = vld [vmem:[%s819_s3 + $0x28] sm:$0xff]  ;;  %v587_v15 = vld [vmem:[%s819_s3 + $0x20] sm:$0xff]  ;;  %v586_v16 = vld [vmem:[%s819_s3 + $0x18] sm:$0xff] }
   0xc   :  { %v585_v17 = vld [vmem:[%s819_s3 + $0x10] sm:$0xff]  ;;  %v584_v18 = vld [vmem:[%s819_s3 + $0x8] sm:$0xff]  ;;  %v583_v19 = vld [vmem:[%s819_s3] sm:$0xff] }
   0xd   :  { %v598_v20 = vld [vmem:[%s821_s5 + $0x38] sm:$0xff]  ;;  %v597_v21 = vld [vmem:[%s821_s5 + $0x30] sm:$0xff]  ;;  %v596_v22 = vld [vmem:[%s821_s5 + $0x28] sm:$0xff] }
   0xe   :  { %101 = vmatpush.bf16.msra.mxu0 %v579_v3  ;;  %116 = vmatpush.bf16.msra.mxu1 %v579_v3  ;;  %v595_v23 = vld [vmem:[%s821_s5 + $0x20] sm:$0xff]  ;;  %v594_v26 = vld [vmem:[%s821_s5 + $0x18] sm:$0xff]  ;;  %v593_v28 = vld [vmem:[%s821_s5 + $0x10] sm:$0xff] }
   0xf   :  { %132 = vmatpush.bf16.msra.mxu2 %v579_v3  ;;  %148 = vmatpush.bf16.msra.mxu3 %v579_v3  ;;  %v608_v32 = vld [vmem:[%s818_s2] ss:$0 sm:$0xff]  ;;  %v592_v41 = vld [vmem:[%s821_s5 + $0x8] sm:$0xff]  ;;  %v606_v43 = vld [vmem:[%s823_s7 + $0x38] sm:$0xff] }
  0x10   :  { %v591_v42 = vld [vmem:[%s821_s5] sm:$0xff]  ;;  %v605_v44 = vld [vmem:[%s823_s7 + $0x30] sm:$0xff]  ;;  %v604_v45 = vld [vmem:[%s823_s7 + $0x28] sm:$0xff] }
  0x11   :  { %v603_v46 = vld [vmem:[%s823_s7 + $0x20] sm:$0xff]  ;;  %v602_v47 = vld [vmem:[%s823_s7 + $0x18] sm:$0xff]  ;;  %v601_v48 = vld [vmem:[%s823_s7 + $0x10] sm:$0xff] }
  0x12   :  { %102 = vmatpush.bf16.msra.mxu0 %v578_v4  ;;  %117 = vmatpush.bf16.msra.mxu1 %v578_v4  ;;  %v609_v49 = vld [vmem:[%s820_s4] ss:$0 sm:$0xff]  ;;  %v600_v55 = vld [vmem:[%s823_s7 + $0x8] sm:$0xff] }
  0x13   :  { %133 = vmatpush.bf16.msra.mxu2 %v578_v4  ;;  %149 = vmatpush.bf16.msra.mxu3 %v578_v4  ;;  %v599_v56 = vld [vmem:[%s823_s7] sm:$0xff] }
  0x14   :  { %v610_v57 = vld [vmem:[%s822_s6] ss:$0 sm:$0xff]  ;;  %s642_s6 = smov [#allocation2]  }
  0x15   :  { %v611_v63 = vld [vmem:[%s824_s8] ss:$0 sm:$0xff]  ;;  %s433_s7 = sshll.u32 %s642_s6, 4  ;;  %s434_s7 = int_to_ptr.vmem [resolvable:$true] %s433_s7 }
  0x16   :  { %103 = vmatpush.bf16.msra.mxu0 %v577_v5  ;;  %118 = vmatpush.bf16.msra.mxu1 %v577_v5 }
  0x17   :  { %134 = vmatpush.bf16.msra.mxu2 %v577_v5  ;;  %150 = vmatpush.bf16.msra.mxu3 %v577_v5 }
  0x1a   :  { %104 = vmatpush.bf16.msra.mxu0 %v576_v6  ;;  %119 = vmatpush.bf16.msra.mxu1 %v576_v6 }
  0x1b   :  { %135 = vmatpush.bf16.msra.mxu2 %v576_v6  ;;  %151 = vmatpush.bf16.msra.mxu3 %v576_v6 }
  0x1e   :  { %105 = vmatpush.bf16.msra.mxu0 %v575_v7  ;;  %120 = vmatpush.bf16.msra.mxu1 %v575_v7 }
  0x1f   :  { %136 = vmatpush.bf16.msra.mxu2 %v575_v7  ;;  %152 = vmatpush.bf16.msra.mxu3 %v575_v7 }
  0x21   :  { %106 = vmatmul.bf16.vlgmr.msra.gmra.mxu0 %v33_v9  ;;  %121 = vmatmul.bf16.vlgmr.msra.gmra.mxu1 %v476_v10 }
  0x22   :  { %234 = vmatpush.bf16.msrb.mxu0 %v590_v8  ;;  %137 = vmatmul.bf16.vlgmr.msra.gmra.mxu2 %v477_v11 }
  0x23   :  { %153 = vmatmul.bf16.vlgmr.msra.gmra.mxu3 %v478_v12  ;;  %317 = vmatpush.bf16.msrb.mxu1 %v598_v20 }
  0x24   :  { %400 = vmatpush.bf16.msrb.mxu2 %v606_v43 }
  0x26   :  { %235 = vmatpush.bf16.msrb.mxu0 %v589_v13 }
  0x27   :  { %318 = vmatpush.bf16.msrb.mxu1 %v597_v21 }
  0x28   :  { %401 = vmatpush.bf16.msrb.mxu2 %v605_v44 }
  0x2a   :  { %236 = vmatpush.bf16.msrb.mxu0 %v588_v14 }
  0x2b   :  { %319 = vmatpush.bf16.msrb.mxu1 %v596_v22 }
  0x2c   :  { %402 = vmatpush.bf16.msrb.mxu2 %v604_v45 }
  0x2e   :  { %237 = vmatpush.bf16.msrb.mxu0 %v587_v15 }
  0x2f   :  { %320 = vmatpush.bf16.msrb.mxu1 %v595_v23 }
  0x30   :  { %403 = vmatpush.bf16.msrb.mxu2 %v603_v46 }
  0x32   :  { %238 = vmatpush.bf16.msrb.mxu0 %v586_v16 }
  0x33   :  { %321 = vmatpush.bf16.msrb.mxu1 %v594_v26 }
  0x34   :  { %404 = vmatpush.bf16.msrb.mxu2 %v602_v47 }
  0x36   :  { %239 = vmatpush.bf16.msrb.mxu0 %v585_v17 }
  0x37   :  { %322 = vmatpush.bf16.msrb.mxu1 %v593_v28 }
  0x38   :  { %405 = vmatpush.bf16.msrb.mxu2 %v601_v48 }
  0x3a   :  { %240 = vmatpush.bf16.msrb.mxu0 %v584_v18 }
  0x3b   :  { %323 = vmatpush.bf16.msrb.mxu1 %v592_v41 }
  0x3c   :  { %406 = vmatpush.bf16.msrb.mxu2 %v600_v55 }
  0x3e   :  { %241 = vmatpush.bf16.msrb.mxu0 %v583_v19 }
  0x3f   :  { %324 = vmatpush.bf16.msrb.mxu1 %v591_v42 }
  0x40   :  { %407 = vmatpush.bf16.msrb.mxu2 %v599_v56 }
  0x9e   :  { %v107_v24 = vpop.f32.mrf.mxu0  ;;  %v122_v25 = vpop.f32.mrf.mxu1 }
  0x9f   :  { %v126_v27 = vmax.f32 %v107_v24, %v122_v25 }
  0xa5   :  { %v138_v29 = vpop.f32.mrf.mxu2 }
  0xa6   :  { %v154_v30 = vpop.f32.mrf.mxu3  ;;  %v142_v31 = vmax.f32 %v126_v27, %v138_v29  ;;  %v109_v33 = vpop.f32.mrf.mxu0 }
  0xa7   :  { %v124_v34 = vpop.f32.mrf.mxu1 }
  0xa8   :  { %v158_v35 = vmax.f32 %v142_v31, %v154_v30 }
  0xaa   :  { %v163_v36 = vadd.f32 %v608_v32, %v158_v35 }
  0xac   :  { %v164_v37 = vmax.f32 %v163_v36, 0.0 }
  0xad   :  { %v140_v38 = vpop.f32.mrf.mxu2 }
  0xae   :  { %v156_v39 = vpop.f32.mrf.mxu3  ;;  %v165_v40 = vpack.c.bf16 %v164_v37, %v164_v37 }
  0xb0   :  { %242 = vmatmul.bf16.vlgmr.msrb.gmra.mxu0 %v165_v40 }
 0x12d   :  { %v243_v50 = vpop.f32.mrf.mxu0 }
 0x12e   :  { %v244_v51 = vadd.f32 %v609_v49, %v243_v50 }
 0x130   :  { %v247_v52 = vmax.f32 %v244_v51, 0.0 }
 0x132   :  { %v248_v53 = vpack.c.bf16 %v247_v52, %v247_v52 }
 0x134   :  { %325 = vmatmul.bf16.vlgmr.msrb.gmra.mxu1 %v248_v53 }
 0x135   :  { %v245_v54 = vpop.f32.mrf.mxu0 }
 0x1b1   :  { %v326_v58 = vpop.f32.mrf.mxu1 }
 0x1b2   :  { %v327_v59 = vadd.f32 %v610_v57, %v326_v58 }
 0x1b4   :  { %v330_v60 = vmax.f32 %v327_v59, 0.0 }
 0x1b6   :  { %v331_v61 = vpack.c.bf16 %v330_v60, %v330_v60 }
 0x1b8   :  { %408 = vmatmul.bf16.vlgmr.msrb.gmra.mxu2 %v331_v61 }
 0x1b9   :  { %v328_v62 = vpop.f32.mrf.mxu1 }
 0x23b   :  { %v409_v0 = vpop.f32.mrf.mxu2 }
 0x23c   :  { %v410_v1 = vadd.f32 %v611_v63, %v409_v0 }
 0x23e   :  { %v414_v2 = vsel %vm413_vm0, %v410_v1, -inf }
 0x23f   :  { %415 = vmax.xlane.f32.xlu0 %v414_v2 }
 0x243   :  { %v411_v3 = vpop.f32.mrf.mxu2 }
 0x2b2   :  { %v416_v4 = vpop.xlane.xlu0 %415 }
 0x2b3   :  { %v417_v5 = vsub.f32 %v410_v1, %v416_v4 }
 0x2b5   :  { %v418_v6 = vmul.f32 1.442695, %v417_v5 }
 0x2b7   :  { %612 = vpow2.f32 %v418_v6 }
 0x2bd   :  { %v613_v7 = vpop.eup %612 }
 0x2be   :  { %v420_v8 = vsel %vm413_vm0, %v613_v7, 0.0 }
 0x2bf   :  { %421 = vadd.xlane.f32.xlu0 %v420_v8 }
 0x332   :  { %v422_v9 = vpop.xlane.xlu0 %421 }
 0x333   :  { %614 = vlog2.f32 %v422_v9 }
 0x339   :  { %v615_v10 = vpop.eup %614 }
 0x33a   :  { %v424_v11 = vmul.f32 0.6931472, %v615_v10 }
 0x33c   :  { %v425_v12 = vadd.f32 %v424_v11, %v416_v4 }
 0x33e   :  { %v426_v13 = vsub.f32 %v410_v1, %v425_v12 }
 0x340   :  { %427 = vst [vmem:[#allocation2] sm:$0x3] %v426_v13 }
 0x341   :  { %438 = dma.vmem_to_hbm [thread:$0]  %s434_s7, 32, %s436_s17, [#allocation3]  }
 0x342   :  { %640 = dma.done.wait [#allocation3], 32  }
 0x343   :  { %641 = vsyncadd [#allocation3], 4294967264 }
 0x344   :  { %443 = vsyncpa [#allocation3], 1 }

</bundles_post_ra>
